<compile_context>
chip_gen: v6e
topology: v6e:2x2x1
jax: 0.10.0
libtpu: 0.0.40
codegen_flags: <defaults>
</compile_context>

<pallas_src>
import functools

import jax
import jax.numpy as jnp
from jax.experimental import pallas as pl
from jax.experimental.pallas import tpu as pltpu

_EPS = 1e-8  # matches torch.nn.CosineSimilarity default


def _round_up(n, m):
    return ((n + m - 1) // m) * m


def _cdiv(a, b):
    return -(-a // b)


def _choose_tm(bx):
    """Row-tile size: multiple of 8, <=512 rows, >=2 grid steps when possible."""
    bx8 = _round_up(max(bx, 1), 8)
    n_steps = max(_cdiv(bx8, 512), 1)
    if bx8 >= 16:
        n_steps = max(n_steps, 2)   # let v7x's 2nd TensorCore / pipeline work
    return _round_up(_cdiv(bx8, n_steps), 8)


# --------------------------------------------------------------------------
# Fused kernel: GEMM (MXU) + x row-norm (VPU/XLU) + normalize epilogue.
# --------------------------------------------------------------------------
def _cos_sim_kernel(x_ref, yt_ref, yn_ref, o_ref, *, clamp):
    # x_ref : (TM, Hp)  native dtype
    # yt_ref: (Hp, Byp) native dtype, resident (constant index_map)
    # yn_ref: (1, Byp)  f32, = temp * ||y||, resident
    # o_ref : (TM, Byp)
    x = x_ref[...]

    # MXU: canonical (M,K)@(K,N), f32 accumulation.
    dots = jnp.dot(x, yt_ref[...], preferred_element_type=jnp.float32)

    # Fused per-row L2 norm of x (hidden under the MXU / DMA).
    xf = x.astype(jnp.float32)
    xn = jnp.sqrt(jnp.sum(xf * xf, axis=-1, keepdims=True))          # (TM, 1)

    # cos/temp = dots / max(temp*||x||*||y||, temp*eps); temp is folded into
    # yn_ref and clamp.  Reciprocal goes to the EUP slot (approx=True).
    denom = jnp.maximum(xn * yn_ref[...], clamp)                      # (TM, Byp)
    o_ref[...] = (dots * pl.reciprocal(denom, approx=True)).astype(o_ref.dtype)


def similarity(x, y, temp, *, out_dtype=jnp.float32):
    """Pallas equivalent of Similarity(temp)(x, y).

    x: (Bx, 1, H) or (Bx, H)
    y: (1, By, H) or (By, H)
    returns: (Bx, By) in `out_dtype` (default float32).
    """
    if x.ndim == 3:
        x = jnp.squeeze(x, axis=1)     # (Bx, H)
    if y.ndim == 3:
        y = jnp.squeeze(y, axis=0)     # (By, H)

    bx, h = x.shape
    by, h2 = y.shape
    assert h == h2, "hidden dims must match"
    temp = float(temp)  # constructor constant in the PyTorch module

    # y row norms once, scaled by temp (plain jnp -> fused by XLA, no launch).
    yf = y.astype(jnp.float32)
    yn = jnp.sqrt(jnp.sum(yf * yf, axis=-1)) * temp                   # (By,)

    # Tiling / padding.
    tm = _choose_tm(bx)
    bx_pad = _round_up(bx, tm)
    by_pad = _round_up(by, 128)       # lane-dense output stores
    h_pad = _round_up(h, 128)         # lane-dense loads, packed MXU K

    if bx_pad != bx or h_pad != h:
        x = jnp.pad(x, ((0, bx_pad - bx), (0, h_pad - h)))
    if by_pad != by or h_pad != h:
        y = jnp.pad(y, ((0, by_pad - by), (0, h_pad - h)))
    y_t = y.T                          # (Hp, Byp): one-time layout plumbing

    yn_row = yn.reshape(1, by)
    if by_pad != by:
        yn_row = jnp.pad(yn_row, ((0, 0), (0, by_pad - by)))
    yn_row = yn_row.astype(jnp.float32)

    kernel = functools.partial(_cos_sim_kernel, clamp=temp * _EPS)

    # VMEM budget from actual buffer sizes (double-buffered), clamped to a
    # range that is safe on v5e/v6e (128 MiB) and v7x (64 MiB physical).
    in_bytes = jnp.dtype(x.dtype).itemsize
    out_bytes = jnp.dtype(out_dtype).itemsize
    vmem_need = (2 * tm * h_pad * in_bytes            # x tile
                 + 2 * h_pad * by_pad * in_bytes      # resident y
                 + 2 * by_pad * 4                     # resident y-norm row
                 + 2 * tm * by_pad * out_bytes)       # output tile
    vmem_limit = int(min(max(vmem_need + (4 << 20), 32 << 20), 64 << 20))

    out = pl.pallas_call(
        kernel,
        out_shape=jax.ShapeDtypeStruct((bx_pad, by_pad), out_dtype),
        grid_spec=pltpu.PrefetchScalarGridSpec(
            num_scalar_prefetch=0,
            grid=(bx_pad // tm,),
            in_specs=[
                pl.BlockSpec((tm, h_pad), lambda i: (i, 0)),      # x tile
                pl.BlockSpec((h_pad, by_pad), lambda i: (0, 0)),  # y^T resident
                pl.BlockSpec((1, by_pad), lambda i: (0, 0)),      # temp*||y||
            ],
            out_specs=pl.BlockSpec((tm, by_pad), lambda i: (i, 0)),
        ),
        compiler_params=pltpu.CompilerParams(
            dimension_semantics=("parallel",),
            vmem_limit_bytes=vmem_limit,
        ),
    )(x, y_t, yn_row)

    return out[:bx, :by]


# --------------------------------------------------------------------------
# Reference + self-test
# --------------------------------------------------------------------------
def _reference(x, y, temp):
    x = jnp.squeeze(x, axis=1) if x.ndim == 3 else x
    y = jnp.squeeze(y, axis=0) if y.ndim == 3 else y
    x = x.astype(jnp.float32)
    y = y.astype(jnp.float32)
    xn = jnp.sqrt(jnp.sum(x * x, axis=-1, keepdims=True))
    yn = jnp.sqrt(jnp.sum(y * y, axis=-1, keepdims=True))
    return (x @ y.T) / jnp.maximum(xn * yn.T, _EPS) / temp


if __name__ == "__main__":
    key = jax.random.PRNGKey(0)
    kx, ky, ka, kb = jax.random.split(key, 4)
    temp = 0.05  # SimCSE default temperature

    # Test 1: f32, PyTorch-style broadcast inputs x.unsqueeze(1), y.unsqueeze(0).
    batch, hidden = 8, 32
    x = jax.random.normal(kx, (batch, 1, hidden), dtype=jnp.float32)
    y = jax.random.normal(ky, (1, batch, hidden), dtype=jnp.float32)
    out = jax.block_until_ready(similarity(x, y, temp))
    ref = _reference(x, y, temp)
    assert out.shape == (batch, batch)
    assert jnp.allclose(out, ref, atol=1e-3, rtol=5e-3), (
        f"f32 max abs err {jnp.max(jnp.abs(out - ref))}"
    )

    # Test 2: bf16 inputs, ragged shapes (padding, >=2 grid steps, native dtype).
    bx2, by2, hidden2 = 10, 12, 48
    xb = jax.random.normal(ka, (bx2, 1, hidden2), jnp.float32).astype(jnp.bfloat16)
    yb = jax.random.normal(kb, (1, by2, hidden2), jnp.float32).astype(jnp.bfloat16)
    outb = jax.block_until_ready(similarity(xb, yb, temp))
    refb = _reference(xb, yb, temp)  # same bf16-rounded values, f32 math
    assert outb.shape == (bx2, by2)
    assert jnp.allclose(outb, refb, atol=1e-2, rtol=1e-2), (
        f"bf16 max abs err {jnp.max(jnp.abs(outb - refb))}"
    )

    print("KERNEL_OK")
</pallas_src>

<mosaic_0001>
module attributes {stable_mosaic.version = 11 : i64} {
  func.func @_cos_sim_kernel(%arg0: i32, %arg1: memref<8x128xf32, #tpu.memory_space<vmem>>, %arg2: memref<128x128xf32, #tpu.memory_space<vmem>>, %arg3: memref<1x128xf32, #tpu.memory_space<vmem>>, %arg4: memref<8x128xf32, #tpu.memory_space<vmem>>) attributes {dimension_semantics = [#tpu.dimension_semantics<parallel>], iteration_bounds = array<i64: 1>, scalar_prefetch = 0 : i64, scratch_operands = 0 : i64, tpu.core_type = #tpu.core_type<tc>, window_params = [{transform_indices = @transform_0, window_bounds = array<i64: 8, 128>}, {pipeline_mode = #tpu.pipeline_mode<synchronous>, transform_indices = @transform_1, window_bounds = array<i64: 128, 128>}, {pipeline_mode = #tpu.pipeline_mode<synchronous>, transform_indices = @transform_2, window_bounds = array<i64: 1, 128>}, {transform_indices = @transform_3, window_bounds = array<i64: 8, 128>}]} {
    %c0 = arith.constant 0 : index
    %c0_0 = arith.constant 0 : index
    %0 = vector.load %arg1[%c0, %c0_0] : memref<8x128xf32, #tpu.memory_space<vmem>>, vector<8x128xf32>
    %c0_1 = arith.constant 0 : index
    %c0_2 = arith.constant 0 : index
    %1 = vector.load %arg2[%c0_1, %c0_2] : memref<128x128xf32, #tpu.memory_space<vmem>>, vector<128x128xf32>
    %cst = arith.constant dense<0.000000e+00> : vector<8x128xf32>
    %2 = tpu.matmul %0, %1, %cst {dimension_numbers = #tpu.dot_dimension_numbers<[1], [0], [0], [1], [0, 0, 1, 1], [], []>} : vector<8x128xf32>, vector<128x128xf32>, vector<8x128xf32> -> vector<8x128xf32>
    %3 = arith.mulf %0, %0 : vector<8x128xf32>
    %cst_3 = arith.constant dense<0.000000e+00> : vector<8xf32>
    %4 = vector.multi_reduction <add>, %3, %cst_3 [1] : vector<8x128xf32> to vector<8xf32>
    %5 = vector.shape_cast %4 : vector<8xf32> to vector<8x1xf32>
    %6 = math.sqrt %5 : vector<8x1xf32>
    %c0_4 = arith.constant 0 : index
    %c0_5 = arith.constant 0 : index
    %7 = vector.load %arg3[%c0_4, %c0_5] : memref<1x128xf32, #tpu.memory_space<vmem>>, vector<1x128xf32>
    %8 = vector.broadcast %6 : vector<8x1xf32> to vector<8x128xf32>
    %9 = vector.broadcast %7 : vector<1x128xf32> to vector<8x128xf32>
    %10 = arith.mulf %8, %9 : vector<8x128xf32>
    %cst_6 = arith.constant 5.000000e-10 : f32
    %11 = vector.broadcast %cst_6 : f32 to vector<8x128xf32>
    %12 = arith.maximumf %10, %11 : vector<8x128xf32>
    %13 = tpu.reciprocal %12 {approx = true} : vector<8x128xf32> -> vector<8x128xf32>
    %14 = arith.mulf %2, %13 : vector<8x128xf32>
    %c0_7 = arith.constant 0 : index
    %c0_8 = arith.constant 0 : index
    %15 = vector.load %arg4[%c0_7, %c0_8] : memref<8x128xf32, #tpu.memory_space<vmem>>, vector<8x128xf32>
    tpu.vector_store %arg4[%c0_7, %c0_8], %14 {strides = array<i32>} : memref<8x128xf32, #tpu.memory_space<vmem>>, vector<8x128xf32>,
    return
  }
  func.func @transform_0(%arg0: i32) -> (i32, i32) {
    %c0_i32 = arith.constant 0 : i32
    %c0_i32_0 = arith.constant 0 : i32
    return %arg0, %c0_i32 : i32, i32
  }
  func.func @transform_1(%arg0: i32) -> (i32, i32) {
    %c0_i32 = arith.constant 0 : i32
    %c0_i32_0 = arith.constant 0 : i32
    %c0_i32_1 = arith.constant 0 : i32
    return %c0_i32, %c0_i32_0 : i32, i32
  }
  func.func @transform_2(%arg0: i32) -> (i32, i32) {
    %c0_i32 = arith.constant 0 : i32
    %c0_i32_0 = arith.constant 0 : i32
    %c0_i32_1 = arith.constant 0 : i32
    return %c0_i32, %c0_i32_0 : i32, i32
  }
  func.func @transform_3(%arg0: i32) -> (i32, i32) {
    %c0_i32 = arith.constant 0 : i32
    %c0_i32_0 = arith.constant 0 : i32
    return %arg0, %c0_i32 : i32, i32
  }
}

</mosaic_0001>

<bundles_post_ra>
// kernel: tpu_custom_call.1
= control target key start
LH: loop header
LB: loop body
LE: loop exit
PB: predicated region body
PF: predicated region fallthrough
CT: control target
= control target key end

     0   :  { %8 = vsyncpa [#allocation3], 0  ;;  %s335_s0 = inlined_call_operand.hbm [shape: f32[8,128], index: 0, kind: input, shape index: {}]   ;;  %s336_s1 = inlined_call_operand.hbm [shape: f32[128,128], index: 1, kind: input, shape index: {}]   ;;  %s337_s2 = inlined_call_operand.vmem [shape: f32[1,128], index: 2, kind: input, shape index: {}]   ;;  %s338_s3 = inlined_call_operand.hbm [shape: f32[8,128], index: 3, kind: output, shape index: {}]  }
   0x1   :  { %9 = vsyncpa [#allocation6], 0 }
   0x2   :  { %10 = vsyncpa [#allocation4], 0  ;;  %s296_s12 = smov [#allocation2]   ;;  %s297_s14 = smov [#allocation5]  }
   0x3   :  { %s17_s13 = sshll.u32 %s296_s12, 4  ;;  %s26_s15 = sshll.u32 %s297_s14, 4  ;;  %s18_s13 = int_to_ptr.vmem [resolvable:$true] %s17_s13  ;;  %s27_s15 = int_to_ptr.vmem [resolvable:$true] %s26_s15 }
   0x4   :  { %s238_s16 = scalar_lea.vmem %s18_s13, 128  ;;  %p243_p1 = scmp.lt.s32.totalorder %s18_s13, %s18_s13 }
   0x5   :  { %p239_p0 = scmp.ne.s32.totalorder %s18_s13, %s238_s16  ;;  %p244_p2 = scmp.lt.s32.totalorder %s238_s16, %s238_s16 }
   0x7   :  { %p245_p3 = por %p244_p2, %p243_p1 }
   0x9   :  { %p246_p4 = pnand %p245_p3, %p239_p0 }
   0xb   :  { %249 = shalt.err (!%p246_p4)
}
   0xc   :  { %20 = dma.hbm_to_vmem [thread:$0]  %s335_s0, 128, %s18_s13, [#allocation3]  }
   0xd   :  { %s258_s19 = scalar_lea.vmem %s27_s15, 2048  ;;  %p263_p6 = scmp.lt.s32.totalorder %s27_s15, %s27_s15 }
   0xe   :  { %p259_p5 = scmp.ne.s32.totalorder %s27_s15, %s258_s19  ;;  %p264_p7 = scmp.lt.s32.totalorder %s258_s19, %s258_s19 }
  0x10   :  { %p265_p8 = por %p264_p7, %p263_p6 }
  0x12   :  { %p266_p9 = pnand %p265_p8, %p259_p5 }
  0x14   :  { %269 = shalt.err (!%p266_p9)
}
  0x15   :  { %s298_s20 = smov 128   ;;  %s299_s21 = smov 8  }
  0x16   :  { %32 = dma.hbm_to_vmem [thread:$0]  %s336_s1, 2048, %s27_s15, [#allocation6], %s298_s20, %s298_s20, %s299_s21  }
  0x17   :  { %290 = dma.done.wait [#allocation3], 128  }
  0x18   :  { %291 = vsyncadd [#allocation3], 4294967168 }
  0x19   :  { %292 = dma.done.wait [#allocation6], 2048  }
  0x1a   :  { %293 = vsyncadd [#allocation6], 4294965248  ;;  %v300_v0 = vmov 0.0   ;;  %vm301_vm0 = vmmov 0   ;;  %v57_v1 = vld [vmem:[#allocation5 + $0x78] sm:$0xff]  ;;  %v56_v2 = vld [vmem:[#allocation5 + $0x70] sm:$0xff] }
  0x1b   :  { %184 = vmatprep.subr.mxu0 %v300_v0  ;;  %216 = vmatprep.mubr.msk.f32.mxu0 %vm301_vm0, %v300_v0  ;;  %v55_v3 = vld [vmem:[#allocation5 + $0x68] sm:$0xff]  ;;  %v54_v4 = vld [vmem:[#allocation5 + $0x60] sm:$0xff]  ;;  %v41_v5 = vld [vmem:[#allocation2] sm:$0xff]  ;;  %s302_s24 = smov [#allocation7]  }
  0x1c   :  { %185 = vmatpush3.msra.mxu0 %v57_v1  ;;  %v53_v6 = vld [vmem:[#allocation5 + $0x58] sm:$0xff]  ;;  %v128_v7 = vmul.f32 %v41_v5, %v41_v5  ;;  %v52_v8 = vld [vmem:[#allocation5 + $0x50] sm:$0xff]  ;;  %v51_v9 = vld [vmem:[#allocation5 + $0x48] sm:$0xff]  ;;  %s156_s25 = sshll.u32 %s302_s24, 4  ;;  %s157_s25 = int_to_ptr.vmem [resolvable:$true] %s156_s25 }
  0x1d   :  { %186 = vmatprep.subr.mxu0 %v300_v0  ;;  %v50_v10 = vld [vmem:[#allocation5 + $0x40] sm:$0xff]  ;;  %v49_v11 = vld [vmem:[#allocation5 + $0x38] sm:$0xff]  ;;  %v48_v12 = vld [vmem:[#allocation5 + $0x30] sm:$0xff]  ;;  %s270_s26 = scalar_lea.vmem %s157_s25, 128  ;;  %p275_p11 = scmp.lt.s32.totalorder %s157_s25, %s157_s25 }
  0x1e   :  { %187 = vmatpush3.msra.mxu0 %v56_v2  ;;  %129 = vadd.xlane.f32.xlu0 %v128_v7  ;;  %v47_v13 = vld [vmem:[#allocation5 + $0x28] sm:$0xff]  ;;  %v46_v14 = vld [vmem:[#allocation5 + $0x20] sm:$0xff]  ;;  %v45_v15 = vld [vmem:[#allocation5 + $0x18] sm:$0xff]  ;;  %p271_p10 = scmp.ne.s32.totalorder %s157_s25, %s270_s26  ;;  %p276_p12 = scmp.lt.s32.totalorder %s270_s26, %s270_s26 }
  0x1f   :  { %188 = vmatprep.subr.mxu0 %v300_v0  ;;  %v44_v16 = vld [vmem:[#allocation5 + $0x10] sm:$0xff]  ;;  %v43_v17 = vld [vmem:[#allocation5 + $0x8] sm:$0xff]  ;;  %v42_v18 = vld [vmem:[#allocation5] sm:$0xff] }
  0x20   :  { %189 = vmatpush3.msra.mxu0 %v55_v3  ;;  %v166_v25 = vld [vmem:[%s337_s2] ss:$0 sm:$0xff]  ;;  %p277_p13 = por %p276_p12, %p275_p11 }
  0x21   :  { %190 = vmatprep.subr.mxu0 %v300_v0 }
  0x22   :  { %191 = vmatpush3.msra.mxu0 %v54_v4  ;;  %p278_p0 = pnand %p277_p13, %p271_p10 }
  0x23   :  { %192 = vmatprep.subr.mxu0 %v300_v0 }
  0x24   :  { %193 = vmatpush3.msra.mxu0 %v53_v6 }
  0x25   :  { %194 = vmatprep.subr.mxu0 %v300_v0 }
  0x26   :  { %195 = vmatpush3.msra.mxu0 %v52_v8 }
  0x27   :  { %196 = vmatprep.subr.mxu0 %v300_v0 }
  0x28   :  { %197 = vmatpush3.msra.mxu0 %v51_v9 }
  0x29   :  { %198 = vmatprep.subr.mxu0 %v300_v0 }
  0x2a   :  { %199 = vmatpush3.msra.mxu0 %v50_v10 }
  0x2b   :  { %200 = vmatprep.subr.mxu0 %v300_v0 }
  0x2c   :  { %201 = vmatpush3.msra.mxu0 %v49_v11 }
  0x2d   :  { %202 = vmatprep.subr.mxu0 %v300_v0 }
  0x2e   :  { %203 = vmatpush3.msra.mxu0 %v48_v12 }
  0x2f   :  { %204 = vmatprep.subr.mxu0 %v300_v0 }
  0x30   :  { %205 = vmatpush3.msra.mxu0 %v47_v13 }
  0x31   :  { %206 = vmatprep.subr.mxu0 %v300_v0 }
  0x32   :  { %207 = vmatpush3.msra.mxu0 %v46_v14 }
  0x33   :  { %208 = vmatprep.subr.mxu0 %v300_v0 }
  0x34   :  { %209 = vmatpush3.msra.mxu0 %v45_v15 }
  0x35   :  { %210 = vmatprep.subr.mxu0 %v300_v0 }
  0x36   :  { %211 = vmatpush3.msra.mxu0 %v44_v16 }
  0x37   :  { %212 = vmatprep.subr.mxu0 %v300_v0 }
  0x38   :  { %213 = vmatpush3.msra.mxu0 %v43_v17 }
  0x39   :  { %214 = vmatprep.subr.mxu0 %v300_v0 }
  0x3a   :  { %215 = vmatpush3.msra.mxu0 %v42_v18 }
  0x3b   :  { %217 = vmatmul.mubr.f32.vlgmr.msra.gmra.mxu0 %v41_v5 }
  0xa7   :  { %v130_v19 = vpop.xlane.xlu0 %129 }
  0xa8   :  { %226 = vrsqrt.f32 %v130_v19  ;;  %vm133_vm1 = vcmp.eq.f32.partialorder %v130_v19, inf  ;;  %v136_v22 = vand.u32 2147483648, %v130_v19  ;;  %vm135_vm2 = vcmp.eq.f32.partialorder %v130_v19, 0.0 }
  0xb5   :  { %v227_v20 = vpop.eup %226 }
  0xb6   :  { %v132_v21 = vmul.f32 %v227_v20, %v130_v19 }
  0xb8   :  { %v134_v23 = vsel %vm133_vm1, %v130_v19, %v132_v21 }
  0xb9   :  { %v137_v24 = vsel %vm135_vm2, %v136_v22, %v134_v23 }
  0xba   :  { %v145_v26 = vmul.f32 %v166_v25, %v137_v24 }
  0xbc   :  { %v146_v27 = vmax.f32 %v145_v26, 5e-10 }
  0xbe   :  { %228 = vrcp.f32 %v146_v27 }
  0xcb   :  { %v229_v28 = vpop.eup %228 }
  0xfb   :  { %v124_v29 = vpop.f32.mrf.mxu0 }
  0xfc   :  { %v148_v30 = vmul.f32 %v229_v28, %v124_v29 }
  0xfd   :  { %v218_v31 = vpop.f32.mrf.mxu0 }
  0xfe   :  { %149 = vst [vmem:[#allocation7] sm:$0xff] %v148_v30 }
  0xff   :  { %281 = shalt.err (!%p278_p0)
}
 0x100   :  { %159 = dma.vmem_to_hbm [thread:$0]  %s157_s25, 128, %s338_s3, [#allocation4]  }
 0x101   :  { %294 = dma.done.wait [#allocation4], 128  }
 0x102   :  { %295 = vsyncadd [#allocation4], 4294967168 }
 0x103   :  { %163 = vsyncpa [#allocation3], 1 }
 0x104   :  { %164 = vsyncpa [#allocation6], 1 }
 0x105   :  { %165 = vsyncpa [#allocation4], 1 }

</bundles_post_ra>
